<compile_context>
chip_gen: v5e
topology: v5e:2x2
jax: 0.10.0
libtpu: 0.0.40
codegen_flags: <defaults>
</compile_context>

<pallas_src>
import math

import jax
import jax.numpy as jnp
from jax.experimental import pallas as pl
from jax.experimental.pallas import tpu as pltpu

_LANES = 128


def _round_up(x, k):
    return -(-x // k) * k


def _lorenz63_kernel(coeff_ref, u_ref, out_ref):
    # coeff_ref: (3,) float32 in SMEM -> (sigma, beta, rho).
    # u_ref / out_ref: (3, m_tile, 128) VMEM tiles; ref[c] is a dense
    # (m_tile, 128) slab (full sublane/lane occupancy on the VPU).
    sigma = coeff_ref[0]
    beta = coeff_ref[1]
    rho = coeff_ref[2]

    u0 = u_ref[0].astype(jnp.float32)
    u1 = u_ref[1].astype(jnp.float32)
    u2 = u_ref[2].astype(jnp.float32)

    out_ref[0] = (sigma * (u1 - u0)).astype(out_ref.dtype)
    # rho*u0 - u0*u2 == u0*(rho - u2): one fewer vmul per element.
    out_ref[1] = (u0 * (rho - u2) - u1).astype(out_ref.dtype)
    out_ref[2] = (u0 * u1 - beta * u2).astype(out_ref.dtype)


def _lorenz63_jnp(coeff, u):
    """Pure-jnp fast path / reference. Same math as the kernel (f32 compute)."""
    c = coeff.astype(jnp.float32)
    sigma, beta, rho = c[0], c[1], c[2]
    uf = u.astype(jnp.float32)
    u0, u1, u2 = uf[..., 0], uf[..., 1], uf[..., 2]
    out = jnp.stack(
        (sigma * (u1 - u0), u0 * (rho - u2) - u1, u0 * u1 - beta * u2),
        axis=-1,
    )
    return out.astype(u.dtype)


def _choose_m_tile(m, m_tile, itemsize):
    """Pick a tile along M: dtype sublane minimum, VMEM cap, >=2 grid steps."""
    sub_min = max(8, 32 // itemsize)          # 8 f32, 16 bf16, 32 int8/fp8
    if m <= sub_min:
        return m                              # full (possibly small) dim: allowed
    # Keep 2x double-buffered (input + output) tiles <= ~12 MiB: safe for the
    # 16 MiB scoped-VMEM default on v5e and well under v6e/v7x budgets.
    vmem_cap = (12 << 20) // (4 * 3 * _LANES * itemsize)
    m_tile = max(sub_min, min(m_tile, vmem_cap, _round_up(m, sub_min)))
    m_tile = (m_tile // sub_min) * sub_min
    # Prefer >= 2 grid steps so the "parallel" axis can shard across the two
    # TensorCores on v7x (single-step grids leave one TC idle).
    if -(-m // m_tile) < 2:
        m_tile = max(sub_min, _round_up(-(-m // 2), sub_min))
    return m_tile


def lorenz63_to_soa(u):
    """(..., 3) AoS -> dense (3, M, 128) SoA (zero-padded lanes).

    Convert once outside a solver's time loop; the kernel then runs with no
    per-step transpose traffic.
    """
    shape = u.shape
    assert shape[-1] == 3, "Lorenz63 state must have trailing dim 3"
    n = math.prod(shape[:-1]) if len(shape) > 1 else 1
    u2d = u.reshape(n, 3).T                       # (3, N)
    n_pad = pl.cdiv(n, _LANES) * _LANES
    if n_pad != n:
        u2d = jnp.pad(u2d, ((0, 0), (0, n_pad - n)))
    return u2d.reshape(3, n_pad // _LANES, _LANES)


def lorenz63_from_soa(u_soa, orig_shape):
    """Dense (3, M, 128) SoA -> (..., 3) AoS with the original shape."""
    n = math.prod(orig_shape[:-1]) if len(orig_shape) > 1 else 1
    return u_soa.reshape(3, -1)[:, :n].T.reshape(orig_shape)


def lorenz63_forward_soa(coeff, u_soa, *, m_tile=1024, donate=False):
    """Lorenz63 RHS on the dense SoA layout (3, M, 128) -> (3, M, 128).

    This is the hot-path entry point: no transposes, large HBM-saturating
    tiles, optional in-place update of the state buffer via donate=True.
    """
    assert u_soa.ndim == 3 and u_soa.shape[0] == 3 and u_soa.shape[2] == _LANES
    m = u_soa.shape[1]
    itemsize = jnp.dtype(u_soa.dtype).itemsize
    m_tile = _choose_m_tile(m, m_tile, itemsize)
    grid = (pl.cdiv(m, m_tile),)                  # ragged last block is masked

    n_elems = 3 * m * _LANES
    cost = pl.CostEstimate(
        flops=8 * m * _LANES,                     # ~8 VALU ops per state
        transcendentals=0,
        bytes_accessed=2 * n_elems * itemsize,    # read + write
    )

    kwargs = {}
    if donate:
        # Input u_soa (arg index 1) aliases output 0: per block the input DMA
        # completes before writeback, so in-place update is safe.
        kwargs["input_output_aliases"] = {1: 0}

    return pl.pallas_call(
        _lorenz63_kernel,
        out_shape=jax.ShapeDtypeStruct((3, m, _LANES), u_soa.dtype),
        grid=grid,
        in_specs=[
            pl.BlockSpec(memory_space=pltpu.MemorySpace.SMEM),       # coeff
            pl.BlockSpec((3, m_tile, _LANES), lambda i: (0, i, 0)),  # u
        ],
        out_specs=pl.BlockSpec((3, m_tile, _LANES), lambda i: (0, i, 0)),
        compiler_params=pltpu.CompilerParams(
            dimension_semantics=("parallel",),    # shards across TCs on v7x
        ),
        cost_estimate=cost,
        **kwargs,
    )(coeff.astype(jnp.float32), u_soa)


def lorenz63_forward(coeff, t, u, *, m_tile=1024, min_pallas_elems=65536,
                     force_pallas=None):
    """API-parity wrapper for Lorenz63.forward(t, u) on AoS (..., 3) input.

    For small/medium N the fused jnp expression wins (the AoS<->SoA transposes
    around the kernel cost ~3x the kernel's own HBM traffic); for large N, or
    when the caller already holds SoA state, prefer lorenz63_forward_soa.
    """
    del t  # unused by the forward pass, kept for API parity
    orig_shape = u.shape
    assert orig_shape[-1] == 3, "Lorenz63 state must have trailing dim 3"
    n = math.prod(orig_shape[:-1]) if len(orig_shape) > 1 else 1

    use_pallas = (n >= min_pallas_elems) if force_pallas is None else force_pallas
    if not use_pallas:
        return _lorenz63_jnp(coeff, u)

    u_soa = lorenz63_to_soa(u)
    out_soa = lorenz63_forward_soa(coeff, u_soa, m_tile=m_tile)
    return lorenz63_from_soa(out_soa, orig_shape)


if __name__ == "__main__":
    key = jax.random.PRNGKey(0)
    k1, k2, k3, k4 = jax.random.split(key, 4)

    # Classic Lorenz-63 coefficients as the "parameter".
    coeff = jnp.array([10.0, 8.0 / 3.0, 28.0], dtype=jnp.float32)
    t = jnp.float32(0.0)  # unused

    # 1) Tiny EnKF-like shape (batch=2, ensemble=16): fused jnp fast path.
    u_small = jax.random.normal(k1, (2, 16, 3), dtype=jnp.float32)
    out_small = jax.block_until_ready(lorenz63_forward(coeff, t, u_small))
    ref_small = _lorenz63_jnp(coeff, u_small)
    assert out_small.shape == u_small.shape and out_small.dtype == u_small.dtype
    assert jnp.allclose(out_small, ref_small, atol=1e-5, rtol=1e-5)

    # 2) Same tiny shape forced through the Pallas kernel (single padded tile).
    out_small_pl = jax.block_until_ready(
        lorenz63_forward(coeff, t, u_small, force_pallas=True))
    assert jnp.allclose(out_small_pl, ref_small, atol=1e-5, rtol=1e-5)

    # 3) N = 4*513 (not a multiple of 128) with a small m_tile: exercises lane
    #    padding, a multi-step grid, and a ragged last block.
    u_mid = jax.random.normal(k2, (4, 513, 3), dtype=jnp.float32)
    out_mid = jax.block_until_ready(
        lorenz63_forward(coeff, t, u_mid, m_tile=8, force_pallas=True))
    ref_mid = _lorenz63_jnp(coeff, u_mid)
    assert out_mid.shape == u_mid.shape and out_mid.dtype == u_mid.dtype
    assert jnp.allclose(out_mid, ref_mid, atol=1e-5, rtol=1e-5)

    # 4) SoA hot path: convert once, run with default (large) tiles and a
    #    >=2-step "parallel" grid, convert back once.
    u_big = jax.random.normal(k3, (8, 2048, 3), dtype=jnp.float32)
    u_big_soa = lorenz63_to_soa(u_big)
    out_big_soa = jax.block_until_ready(lorenz63_forward_soa(coeff, u_big_soa))
    out_big = lorenz63_from_soa(out_big_soa, u_big.shape)
    ref_big = _lorenz63_jnp(coeff, u_big)
    assert jnp.allclose(out_big, ref_big, atol=1e-5, rtol=1e-5)

    # 5) SoA path with a donated state buffer (input_output_aliases).
    donate_fwd = jax.jit(
        lambda c, s: lorenz63_forward_soa(c, s, donate=True), donate_argnums=(1,))
    out_donated = jax.block_until_ready(donate_fwd(coeff, lorenz63_to_soa(u_big)))
    assert jnp.allclose(lorenz63_from_soa(out_donated, u_big.shape), ref_big,
                        atol=1e-5, rtol=1e-5)

    # 6) bf16 input: exercises the 16-sublane packed-tile minimum.
    u_bf16 = jax.random.normal(k4, (2, 2048, 3), dtype=jnp.float32).astype(jnp.bfloat16)
    out_bf16 = jax.block_until_ready(
        lorenz63_forward(coeff, t, u_bf16, force_pallas=True))
    ref_bf16 = _lorenz63_jnp(coeff, u_bf16)
    assert out_bf16.dtype == jnp.bfloat16 and out_bf16.shape == u_bf16.shape
    assert jnp.allclose(out_bf16.astype(jnp.float32), ref_bf16.astype(jnp.float32),
                        atol=5e-2, rtol=5e-2)

    print("KERNEL_OK")
</pallas_src>

<mosaic_0001>
module attributes {stable_mosaic.version = 11 : i64} {
  func.func @_lorenz63_kernel(%arg0: i32, %arg1: memref<3xf32, #tpu.memory_space<smem>>, %arg2: memref<3x1x128xf32, #tpu.memory_space<vmem>>, %arg3: memref<3x1x128xf32, #tpu.memory_space<vmem>>) attributes {dimension_semantics = [#tpu.dimension_semantics<parallel>], iteration_bounds = array<i64: 1>, scalar_prefetch = 0 : i64, scratch_operands = 0 : i64, tpu.core_type = #tpu.core_type<tc>, window_params = [{transform_indices = @transform_0, window_bounds = array<i64: 3>}, {transform_indices = @transform_1, window_bounds = array<i64: 3, 1, 128>}, {transform_indices = @transform_2, window_bounds = array<i64: 3, 1, 128>}]} {
    %c0 = arith.constant 0 : index
    %0 = memref.load %arg1[%c0] : memref<3xf32, #tpu.memory_space<smem>>
    %c1 = arith.constant 1 : index
    %1 = memref.load %arg1[%c1] : memref<3xf32, #tpu.memory_space<smem>>
    %c2 = arith.constant 2 : index
    %2 = memref.load %arg1[%c2] : memref<3xf32, #tpu.memory_space<smem>>
    %c0_0 = arith.constant 0 : index
    %c0_1 = arith.constant 0 : index
    %c0_2 = arith.constant 0 : index
    %3 = vector.load %arg2[%c0_0, %c0_1, %c0_2] : memref<3x1x128xf32, #tpu.memory_space<vmem>>, vector<1x1x128xf32>
    %4 = vector.shape_cast %3 : vector<1x1x128xf32> to vector<1x128xf32>
    %c1_3 = arith.constant 1 : index
    %c0_4 = arith.constant 0 : index
    %c0_5 = arith.constant 0 : index
    %5 = vector.load %arg2[%c1_3, %c0_4, %c0_5] : memref<3x1x128xf32, #tpu.memory_space<vmem>>, vector<1x1x128xf32>
    %6 = vector.shape_cast %5 : vector<1x1x128xf32> to vector<1x128xf32>
    %c2_6 = arith.constant 2 : index
    %c0_7 = arith.constant 0 : index
    %c0_8 = arith.constant 0 : index
    %7 = vector.load %arg2[%c2_6, %c0_7, %c0_8] : memref<3x1x128xf32, #tpu.memory_space<vmem>>, vector<1x1x128xf32>
    %8 = vector.shape_cast %7 : vector<1x1x128xf32> to vector<1x128xf32>
    %9 = arith.subf %6, %4 : vector<1x128xf32>
    %10 = vector.broadcast %0 : f32 to vector<1x128xf32>
    %11 = arith.mulf %10, %9 : vector<1x128xf32>
    %c0_9 = arith.constant 0 : index
    %c0_10 = arith.constant 0 : index
    %c0_11 = arith.constant 0 : index
    %12 = vector.load %arg3[%c0_9, %c0_10, %c0_11] : memref<3x1x128xf32, #tpu.memory_space<vmem>>, vector<1x1x128xf32>
    %13 = vector.shape_cast %12 : vector<1x1x128xf32> to vector<1x128xf32>
    %14 = vector.shape_cast %11 : vector<1x128xf32> to vector<1x1x128xf32>
    tpu.vector_store %arg3[%c0_9, %c0_10, %c0_11], %14 {strides = array<i32>} : memref<3x1x128xf32, #tpu.memory_space<vmem>>, vector<1x1x128xf32>,
    %15 = vector.broadcast %2 : f32 to vector<1x128xf32>
    %16 = arith.subf %15, %8 : vector<1x128xf32>
    %17 = arith.mulf %4, %16 : vector<1x128xf32>
    %18 = arith.subf %17, %6 : vector<1x128xf32>
    %c1_12 = arith.constant 1 : index
    %c0_13 = arith.constant 0 : index
    %c0_14 = arith.constant 0 : index
    %19 = vector.load %arg3[%c1_12, %c0_13, %c0_14] : memref<3x1x128xf32, #tpu.memory_space<vmem>>, vector<1x1x128xf32>
    %20 = vector.shape_cast %19 : vector<1x1x128xf32> to vector<1x128xf32>
    %21 = vector.shape_cast %18 : vector<1x128xf32> to vector<1x1x128xf32>
    tpu.vector_store %arg3[%c1_12, %c0_13, %c0_14], %21 {strides = array<i32>} : memref<3x1x128xf32, #tpu.memory_space<vmem>>, vector<1x1x128xf32>,
    %22 = arith.mulf %4, %6 : vector<1x128xf32>
    %23 = vector.broadcast %1 : f32 to vector<1x128xf32>
    %24 = arith.mulf %23, %8 : vector<1x128xf32>
    %25 = arith.subf %22, %24 : vector<1x128xf32>
    %c2_15 = arith.constant 2 : index
    %c0_16 = arith.constant 0 : index
    %c0_17 = arith.constant 0 : index
    %26 = vector.load %arg3[%c2_15, %c0_16, %c0_17] : memref<3x1x128xf32, #tpu.memory_space<vmem>>, vector<1x1x128xf32>
    %27 = vector.shape_cast %26 : vector<1x1x128xf32> to vector<1x128xf32>
    %28 = vector.shape_cast %25 : vector<1x128xf32> to vector<1x1x128xf32>
    tpu.vector_store %arg3[%c2_15, %c0_16, %c0_17], %28 {strides = array<i32>} : memref<3x1x128xf32, #tpu.memory_space<vmem>>, vector<1x1x128xf32>,
    return
  }
  func.func @transform_0(%arg0: i32) -> i32 {
    %c0_i32 = arith.constant 0 : i32
    %c0_i32_0 = arith.constant 0 : i32
    return %c0_i32 : i32
  }
  func.func @transform_1(%arg0: i32) -> (i32, i32, i32) {
    %c0_i32 = arith.constant 0 : i32
    %c0_i32_0 = arith.constant 0 : i32
    %c0_i32_1 = arith.constant 0 : i32
    return %c0_i32, %arg0, %c0_i32_0 : i32, i32, i32
  }
  func.func @transform_2(%arg0: i32) -> (i32, i32, i32) {
    %c0_i32 = arith.constant 0 : i32
    %c0_i32_0 = arith.constant 0 : i32
    %c0_i32_1 = arith.constant 0 : i32
    return %c0_i32, %arg0, %c0_i32_0 : i32, i32, i32
  }
}

</mosaic_0001>

<bundles_post_ra>
// kernel: tpu_custom_call.1
= control target key start
LH: loop header
LB: loop body
LE: loop exit
PB: predicated region body
PF: predicated region fallthrough
CT: control target
= control target key end

     0   :  { %7 = vsyncpa [#allocation5], 0  ;;  %s193_s0 = inlined_call_operand.hbm [shape: f32[3], index: 0, kind: input, shape index: {}]   ;;  %s194_s1 = inlined_call_operand.hbm [shape: f32[3,1,128], index: 1, kind: input, shape index: {}]   ;;  %s195_s2 = inlined_call_operand.hbm [shape: f32[3,1,128], index: 2, kind: output, shape index: {}]  }
   0x1   :  { %8 = vsyncpa [#allocation3], 0 }
   0x2   :  { %9 = vsyncpa [#allocation4], 0  ;;  %s15_s11 = sshll.u32 %s193_s0, 4  ;;  %s23_s14 = sshll.u32 %s194_s1, 4  ;;  %s16_s11 = int_to_ptr.hbm [resolvable:$true] %s15_s11  ;;  %s24_s14 = int_to_ptr.hbm [resolvable:$true] %s23_s14 }
   0x3   :  { %s158_s15 = smov [#allocation2]   ;;  %s159_s16 = smov [#allocation6]  }
   0x4   :  { %18 = dma.hbm_to_smem %s16_s11, 16, %s158_s15, [#allocation5]  }
   0x5   :  { %s25_s17 = sshll.u32 %s159_s16, 4  ;;  %s160_s18 = smov 16   ;;  %s26_s17 = int_to_ptr.vmem [resolvable:$true] %s25_s17 }
   0x6   :  { %s161_s19 = smov 1  }
   0x7   :  { %31 = dma.hbm_to_vmem [thread:$0]  %s24_s14, 48, %s26_s17, [#allocation3], %s160_s18, %s160_s18, %s161_s19  }
   0x8   :  { %152 = dma.done.wait [#allocation5], 16  }
   0x9   :  { %153 = vsyncadd [#allocation5], 4294967280 }
   0xa   :  { %154 = dma.done.wait [#allocation3], 48  }
   0xb   :  { %155 = vsyncadd [#allocation3], 4294967248 }
   0xc   :  { %40 = sfence }
   0xd   :  { %s41_s0 = sld [smem:[#allocation2]]  ;;  %v44_v0 = vld [vmem:[#allocation6] sm:$0x1]  ;;  %v46_v1 = vld [vmem:[#allocation6 + $0x1] sm:$0x1]  ;;  %s162_s21 = smov [#allocation7]  }
   0xe   :  { %s86_s1 = sld [smem:[#allocation2 + $0x2]]  ;;  %v49_v2 = vsub.f32 %v46_v1, %v44_v0  ;;  %v48_v3 = vld [vmem:[#allocation6 + $0x2] sm:$0x1]  ;;  %v59_v7 = vmul.f32 %v46_v1, %v44_v0  ;;  %s69_s22 = sshll.u32 %s162_s21, 4  ;;  %s70_s22 = int_to_ptr.vmem [resolvable:$true] %s69_s22 }
   0xf   :  { %s85_s20 = sld [smem:[#allocation2 + $0x1]]  ;;  %s71_s25 = sshll.u32 %s195_s2, 4  ;;  %s72_s25 = int_to_ptr.hbm [resolvable:$true] %s71_s25 }
  0x13   :  { %v50_v4 = vstv %s41_s0 }
  0x14   :  { %v51_v5 = vmul.f32 %v50_v4, %v49_v2  ;;  %v53_v6 = vstv %s86_s1 }
  0x15   :  { %v54_v8 = vsub.f32 %v53_v6, %v48_v3  ;;  %v60_v9 = vstv %s85_s20 }
  0x16   :  { %52 = vst [vmem:[#allocation7] sm:$0x1] %v51_v5  ;;  %v61_v10 = vmul.f32 %v60_v9, %v48_v3 }
  0x17   :  { %v55_v11 = vmul.f32 %v54_v8, %v44_v0 }
  0x18   :  { %v62_v12 = vsub.f32 %v59_v7, %v61_v10 }
  0x19   :  { %v56_v13 = vsub.f32 %v55_v11, %v46_v1 }
  0x1a   :  { %64 = vst [vmem:[#allocation7 + $0x2] sm:$0x1] %v62_v12 }
  0x1b   :  { %58 = vst [vmem:[#allocation7 + $0x1] sm:$0x1] %v56_v13 }
  0x1c   :  { %77 = dma.vmem_to_hbm [thread:$0]  %s70_s22, 48, %s72_s25, [#allocation4], %s160_s18, %s160_s18, %s161_s19  }
  0x1d   :  { %156 = dma.done.wait [#allocation4], 48  }
  0x1e   :  { %157 = vsyncadd [#allocation4], 4294967248 }
  0x1f   :  { %82 = vsyncpa [#allocation3], 1 }
  0x20   :  { %83 = vsyncpa [#allocation4], 1 }
  0x21   :  { %84 = vsyncpa [#allocation5], 1 }

</bundles_post_ra>
